<compile_context>
chip_gen: v7x
topology: tpu7x:2x2x1
jax: 0.10.0
libtpu: 0.0.40
codegen_flags: <defaults>
</compile_context>

<pallas_src>
import functools

import jax
import jax.numpy as jnp
from jax.experimental import pallas as pl
from jax.experimental.pallas import tpu as pltpu


def _round_up(v, m):
    return ((v + m - 1) // m) * m


def _vmem_bytes(rows, cols, itemsize, sublane=8):
    """Lane/sublane-padded VMEM footprint of a 2-D buffer."""
    return _round_up(rows, sublane) * _round_up(cols, 128) * itemsize


# ----------------------------------------------------------------------------
# Fused kernel.
#   grid = (center-row blocks, k blocks over the N contraction axis)
#   main loop :  acc += adj_c_block (bf16) @ x_aug_block (bf16)   [MXU, f32 acc]
#   epilogue  :  (last k block)  add (1+eps)*x_aug[idx] self term, then run
#                linear0 / GIN MLP / linear1 / relu / linear2 on the tm rows.
# ----------------------------------------------------------------------------
def _critic_kernel(adjc_ref, xaug_ref, xaugc_ref, w0aug_ref, sel_ref,
                   ie_proj_ref, wg1rt_ref, bg1_ref, wg2t_ref, bg2_ref,
                   w1t_ref, b1_ref, w2t_ref, b2_ref, out_ref, acc_ref, *, eps):
    k = pl.program_id(1)

    @pl.when(k == 0)
    def _init():
        acc_ref[...] = jnp.zeros_like(acc_ref)

    # bf16 x bf16 MXU matmul with f32 accumulation (no in-kernel dtype cast).
    acc_ref[...] += jnp.dot(adjc_ref[...], xaug_ref[...],
                            preferred_element_type=jnp.float32)

    @pl.when(k == pl.num_programs(1) - 1)
    def _epilogue():
        # Fold the (1+eps)*I self term for the gathered center rows (kept f32,
        # so a learned / nonzero eps stays exact even though A streams as bf16).
        acc = acc_ref[...] + (1.0 + eps) * xaugc_ref[...]          # [tm, Fp]
        # d = (1+eps) + degree, extracted via a one-hot selector column.
        d = jnp.dot(acc, sel_ref[...], preferred_element_type=jnp.float32)  # [tm,1]
        # agg_x0 = s @ W0^T + d*b0   (b0 folded into row F of w0aug).
        agg_x0 = jnp.dot(acc, w0aug_ref[...],
                         preferred_element_type=jnp.float32)        # [tm, H]
        # GIN MLP layer 1; the initial_embed half is the rank-1 term d*ie_proj.
        pre = (jnp.dot(agg_x0, wg1rt_ref[...], preferred_element_type=jnp.float32)
               + d * ie_proj_ref[...] + bg1_ref[...])               # [tm, 2H]
        h1 = jnp.maximum(pre, 0.0)
        enc = (jnp.dot(h1, wg2t_ref[...], preferred_element_type=jnp.float32)
               + bg2_ref[...])                                      # [tm, 2H]
        # Head: linear1 -> relu -> linear2.
        h2 = jnp.maximum(
            jnp.dot(enc, w1t_ref[...], preferred_element_type=jnp.float32)
            + b1_ref[...], 0.0)                                     # [tm, H]
        out_ref[...] = (jnp.dot(h2, w2t_ref[...], preferred_element_type=jnp.float32)
                        + b2_ref[...])                              # [tm, 1]


def critic_forward(params, x, adj, center_node_index, *, num_hidden, eps=0.0,
                   block_c=None, block_k=None):
    """Pallas implementation of critic.forward.

    x:                 [N, num_features] float32 node features (data.x)
    adj:               [N, N]            float32 dense adjacency (from data)
    center_node_index: [C]               int32 indices (data.center_node_index)
    returns:           [C, 1]            float32
    """
    n, f = x.shape
    h = num_hidden
    c = int(center_node_index.shape[0])

    # ---- tile sizes ----
    fp = _round_up(f + 1, 128)                     # lane-dense feature width
    tm = min(block_c if block_c is not None else 128, _round_up(c, 16))
    c_pad = _round_up(c, tm)
    tk = block_k if block_k is not None else min(2048, _round_up(n, 128))
    n_pad = _round_up(n, tk)

    # ---- host-side prep: only O(C*N) / O(N*Fp) passes (no N^2 work) ----
    x_aug = jnp.concatenate([x, jnp.ones((n, 1), x.dtype)], axis=1)     # [N, F+1]
    x_aug_p = jnp.pad(x_aug, ((0, n_pad - n), (0, fp - (f + 1))))       # [Npad, Fp]
    x_aug_b = x_aug_p.astype(jnp.bfloat16)

    adj_c = adj[center_node_index, :]                                   # [C, N]
    adj_c = jnp.pad(adj_c, ((0, c_pad - c), (0, n_pad - n))).astype(jnp.bfloat16)

    xaug_c = jnp.pad(x_aug[center_node_index, :],
                     ((0, c_pad - c), (0, fp - (f + 1))))               # [Cpad, Fp] f32

    # ---- pre-transposed / pre-folded weights (host-side, free) ----
    w0aug = jnp.zeros((fp, h), jnp.float32)
    w0aug = w0aug.at[:f, :].set(params["w0"].T)          # W0^T
    w0aug = w0aug.at[f, :].set(params["b0"][0])          # b0 via degree column
    sel = jnp.zeros((fp, 1), jnp.float32).at[f, 0].set(1.0)

    wg1 = params["wg1"]                                  # [2H, 2H]
    ie_proj = params["initial_embed"] @ wg1[:, :h].T     # [1, 2H]
    wg1rt = wg1[:, h:].T                                 # [H, 2H]
    wg2t = params["wg2"].T                               # [2H, 2H]
    w1t = params["w1"].T                                 # [2H, H]
    w2t = params["w2"].T                                 # [H, 1]

    # ---- VMEM budget with lane/sublane-padded buffer sizes (v7x: 64 MiB) ----
    vmem = 2 * (_vmem_bytes(tm, tk, 2, 16)               # adj blocks (dbl-buffered)
                + _vmem_bytes(tk, fp, 2, 16)             # x_aug blocks
                + _vmem_bytes(tm, fp, 4)                 # center x_aug blocks
                + _vmem_bytes(tm, 1, 4))                 # output blocks
    vmem += _vmem_bytes(tm, fp, 4)                       # acc scratch
    for r, cdim in [(fp, h), (fp, 1), (1, 2 * h), (h, 2 * h), (1, 2 * h),
                    (2 * h, 2 * h), (1, 2 * h), (2 * h, h), (1, h), (h, 1), (1, 1)]:
        vmem += _vmem_bytes(r, cdim, 4)                  # resident weights
    vmem_limit = int(min(max(vmem + (2 << 20), 8 << 20), 48 << 20))

    weight_spec = pl.BlockSpec(memory_space=pltpu.MemorySpace.VMEM)

    out = pl.pallas_call(
        functools.partial(_critic_kernel, eps=eps),
        out_shape=jax.ShapeDtypeStruct((c_pad, 1), jnp.float32),
        grid=(c_pad // tm, n_pad // tk),
        in_specs=[
            pl.BlockSpec((tm, tk), lambda i, k: (i, k)),    # adjacency rows (bf16)
            pl.BlockSpec((tk, fp), lambda i, k: (k, 0)),    # x_aug k-block (bf16)
            pl.BlockSpec((tm, fp), lambda i, k: (i, 0)),    # center x_aug rows (f32)
            weight_spec, weight_spec, weight_spec, weight_spec, weight_spec,
            weight_spec, weight_spec, weight_spec, weight_spec, weight_spec,
            weight_spec,
        ],
        out_specs=pl.BlockSpec((tm, 1), lambda i, k: (i, 0)),
        scratch_shapes=[pltpu.VMEM((tm, fp), jnp.float32)],
        compiler_params=pltpu.CompilerParams(
            dimension_semantics=("parallel", "arbitrary"),
            vmem_limit_bytes=vmem_limit,
        ),
    )(adj_c, x_aug_b, xaug_c, w0aug, sel, ie_proj, wg1rt, params["bg1"],
      wg2t, params["bg2"], w1t, params["b1"], w2t, params["b2"])

    return out[:c]


def init_params(key, num_features, num_hidden):
    two_h = 2 * num_hidden
    ks = jax.random.split(key, 12)

    def lin(kw, kb, out_dim, in_dim):
        bound = 1.0 / jnp.sqrt(in_dim)
        w = jax.random.uniform(kw, (out_dim, in_dim), jnp.float32, -bound, bound)
        b = jax.random.uniform(kb, (1, out_dim), jnp.float32, -bound, bound)
        return w, b

    w0, b0 = lin(ks[0], ks[1], num_hidden, num_features)      # linear0
    wg1, bg1 = lin(ks[2], ks[3], two_h, two_h)                 # GIN MLP layer 1
    wg2, bg2 = lin(ks[4], ks[5], two_h, two_h)                 # GIN MLP layer 2
    w1, b1 = lin(ks[6], ks[7], num_hidden, two_h)              # linear1
    w2, b2 = lin(ks[8], ks[9], 1, num_hidden)                  # linear2
    initial_embed = jax.random.normal(ks[10], (1, num_hidden), jnp.float32)
    return {"w0": w0, "b0": b0, "wg1": wg1, "bg1": bg1, "wg2": wg2, "bg2": bg2,
            "w1": w1, "b1": b1, "w2": w2, "b2": b2,
            "initial_embed": initial_embed}


def _reference(params, x, adj, idx, num_hidden, eps=0.0):
    """Pure-JAX f32 reference of the original module semantics."""
    x0 = x @ params["w0"].T + params["b0"]
    ie = jnp.broadcast_to(params["initial_embed"], (x.shape[0], num_hidden))
    x_in = jnp.concatenate([ie, x0], axis=1)
    agg = (1.0 + eps) * x_in + adj @ x_in
    h = jax.nn.relu(agg @ params["wg1"].T + params["bg1"])
    enc = h @ params["wg2"].T + params["bg2"]
    center = enc[idx]
    h2 = jax.nn.relu(center @ params["w1"].T + params["b1"])
    return h2 @ params["w2"].T + params["b2"]


if __name__ == "__main__":
    num_features = 4
    num_hidden = 32
    n_nodes = 8

    key = jax.random.PRNGKey(0)
    k_param, k_x, k_adj = jax.random.split(key, 3)

    params = init_params(k_param, num_features, num_hidden)

    x = jax.random.normal(k_x, (n_nodes, num_features), jnp.float32)
    # deterministic undirected 0/1 adjacency without self-loops
    a = (jax.random.uniform(k_adj, (n_nodes, n_nodes)) > 0.6).astype(jnp.float32)
    adj = jnp.clip(a + a.T, 0.0, 1.0) * (1.0 - jnp.eye(n_nodes, dtype=jnp.float32))
    center_node_index = jnp.array([0, 3], dtype=jnp.int32)

    fwd = jax.jit(functools.partial(critic_forward, num_hidden=num_hidden))
    out = jax.block_until_ready(fwd(params, x, adj, center_node_index))

    assert out.shape == (center_node_index.shape[0], 1)
    ref = _reference(params, x, adj, center_node_index, num_hidden)
    # bf16 quantization of the node features on the MXU path bounds the error;
    # the 0/1 adjacency and the (1+eps) self term stay exact (f32 epilogue).
    assert jnp.allclose(out, ref, rtol=1e-2, atol=2e-2), (out, ref)
    print("KERNEL_OK")
</pallas_src>

<mosaic_0001>
module attributes {stable_mosaic.version = 11 : i64} {
  func.func @_critic_kernel(%arg0: i32, %arg1: i32, %arg2: memref<16x128xbf16, #tpu.memory_space<vmem>>, %arg3: memref<128x128xbf16, #tpu.memory_space<vmem>>, %arg4: memref<16x128xf32, #tpu.memory_space<vmem>>, %arg5: memref<128x32xf32, #tpu.memory_space<vmem>>, %arg6: memref<128x1xf32, #tpu.memory_space<vmem>>, %arg7: memref<1x64xf32, #tpu.memory_space<vmem>>, %arg8: memref<32x64xf32, #tpu.memory_space<vmem>>, %arg9: memref<1x64xf32, #tpu.memory_space<vmem>>, %arg10: memref<64x64xf32, #tpu.memory_space<vmem>>, %arg11: memref<1x64xf32, #tpu.memory_space<vmem>>, %arg12: memref<64x32xf32, #tpu.memory_space<vmem>>, %arg13: memref<1x32xf32, #tpu.memory_space<vmem>>, %arg14: memref<32x1xf32, #tpu.memory_space<vmem>>, %arg15: memref<1x1xf32, #tpu.memory_space<vmem>>, %arg16: memref<16x1xf32, #tpu.memory_space<vmem>>, %arg17: memref<16x128xf32, #tpu.memory_space<vmem>>) attributes {dimension_semantics = [#tpu.dimension_semantics<parallel>, #tpu.dimension_semantics<arbitrary>], iteration_bounds = array<i64: 1, 1>, scalar_prefetch = 0 : i64, scratch_operands = 1 : i64, tpu.core_type = #tpu.core_type<tc>, window_params = [{transform_indices = @transform_0, window_bounds = array<i64: 16, 128>}, {transform_indices = @transform_1, window_bounds = array<i64: 128, 128>}, {transform_indices = @transform_2, window_bounds = array<i64: 16, 128>}, {pipeline_mode = #tpu.pipeline_mode<synchronous>, transform_indices = @transform_3, window_bounds = array<i64: 128, 32>}, {pipeline_mode = #tpu.pipeline_mode<synchronous>, transform_indices = @transform_4, window_bounds = array<i64: 128, 1>}, {pipeline_mode = #tpu.pipeline_mode<synchronous>, transform_indices = @transform_5, window_bounds = array<i64: 1, 64>}, {pipeline_mode = #tpu.pipeline_mode<synchronous>, transform_indices = @transform_6, window_bounds = array<i64: 32, 64>}, {pipeline_mode = #tpu.pipeline_mode<synchronous>, transform_indices = @transform_7, window_bounds = array<i64: 1, 64>}, {pipeline_mode = #tpu.pipeline_mode<synchronous>, transform_indices = @transform_8, window_bounds = array<i64: 64, 64>}, {pipeline_mode = #tpu.pipeline_mode<synchronous>, transform_indices = @transform_9, window_bounds = array<i64: 1, 64>}, {pipeline_mode = #tpu.pipeline_mode<synchronous>, transform_indices = @transform_10, window_bounds = array<i64: 64, 32>}, {pipeline_mode = #tpu.pipeline_mode<synchronous>, transform_indices = @transform_11, window_bounds = array<i64: 1, 32>}, {pipeline_mode = #tpu.pipeline_mode<synchronous>, transform_indices = @transform_12, window_bounds = array<i64: 32, 1>}, {pipeline_mode = #tpu.pipeline_mode<synchronous>, transform_indices = @transform_13, window_bounds = array<i64: 1, 1>}, {transform_indices = @transform_14, window_bounds = array<i64: 16, 1>}]} {
    %c0_i32 = arith.constant 0 : i32
    %0 = arith.cmpi eq, %arg1, %c0_i32 : i32
    %1 = arith.extui %0 : i1 to i32
    %c0_i32_0 = arith.constant 0 : i32
    %2 = arith.cmpi ne, %1, %c0_i32_0 : i32
    scf.if %2 {
      %cst_10 = arith.constant 0.000000e+00 : f32
      %12 = vector.broadcast %cst_10 : f32 to vector<16x128xf32>
      %c0_11 = arith.constant 0 : index
      %c0_12 = arith.constant 0 : index
      %13 = vector.load %arg17[%c0_11, %c0_12] : memref<16x128xf32, #tpu.memory_space<vmem>>, vector<16x128xf32>
      tpu.vector_store %arg17[%c0_11, %c0_12], %12 {strides = array<i32>} : memref<16x128xf32, #tpu.memory_space<vmem>>, vector<16x128xf32>,
    } else {
    }
    %c0 = arith.constant 0 : index
    %c0_1 = arith.constant 0 : index
    %3 = vector.load %arg17[%c0, %c0_1] : memref<16x128xf32, #tpu.memory_space<vmem>>, vector<16x128xf32>
    %c0_2 = arith.constant 0 : index
    %c0_3 = arith.constant 0 : index
    %4 = vector.load %arg2[%c0_2, %c0_3] : memref<16x128xbf16, #tpu.memory_space<vmem>>, vector<16x128xbf16>
    %c0_4 = arith.constant 0 : index
    %c0_5 = arith.constant 0 : index
    %5 = vector.load %arg3[%c0_4, %c0_5] : memref<128x128xbf16, #tpu.memory_space<vmem>>, vector<128x128xbf16>
    %cst = arith.constant dense<0.000000e+00> : vector<16x128xf32>
    %6 = tpu.matmul %4, %5, %cst {dimension_numbers = #tpu.dot_dimension_numbers<[1], [0], [0], [1], [0, 0, 1, 1], [], []>} : vector<16x128xbf16>, vector<128x128xbf16>, vector<16x128xf32> -> vector<16x128xf32>
    %7 = arith.addf %3, %6 : vector<16x128xf32>
    %c0_6 = arith.constant 0 : index
    %c0_7 = arith.constant 0 : index
    %8 = vector.load %arg17[%c0_6, %c0_7] : memref<16x128xf32, #tpu.memory_space<vmem>>, vector<16x128xf32>
    tpu.vector_store %arg17[%c0_6, %c0_7], %7 {strides = array<i32>} : memref<16x128xf32, #tpu.memory_space<vmem>>, vector<16x128xf32>,
    %c0_i32_8 = arith.constant 0 : i32
    %9 = arith.cmpi eq, %arg1, %c0_i32_8 : i32
    %10 = arith.extui %9 : i1 to i32
    %c0_i32_9 = arith.constant 0 : i32
    %11 = arith.cmpi ne, %10, %c0_i32_9 : i32
    scf.if %11 {
      %c0_10 = arith.constant 0 : index
      %c0_11 = arith.constant 0 : index
      %12 = vector.load %arg17[%c0_10, %c0_11] : memref<16x128xf32, #tpu.memory_space<vmem>>, vector<16x128xf32>
      %c0_12 = arith.constant 0 : index
      %c0_13 = arith.constant 0 : index
      %13 = vector.load %arg4[%c0_12, %c0_13] : memref<16x128xf32, #tpu.memory_space<vmem>>, vector<16x128xf32>
      %cst_14 = arith.constant 1.000000e+00 : f32
      %14 = vector.broadcast %cst_14 : f32 to vector<16x128xf32>
      %15 = arith.mulf %14, %13 : vector<16x128xf32>
      %16 = arith.addf %12, %15 : vector<16x128xf32>
      %c0_15 = arith.constant 0 : index
      %c0_16 = arith.constant 0 : index
      %17 = vector.load %arg6[%c0_15, %c0_16] : memref<128x1xf32, #tpu.memory_space<vmem>>, vector<128x1xf32>
      %cst_17 = arith.constant dense<0.000000e+00> : vector<16x1xf32>
      %18 = tpu.matmul %16, %17, %cst_17 {dimension_numbers = #tpu.dot_dimension_numbers<[1], [0], [0], [1], [0, 0, 1, 1], [], []>} : vector<16x128xf32>, vector<128x1xf32>, vector<16x1xf32> -> vector<16x1xf32>
      %c0_18 = arith.constant 0 : index
      %c0_19 = arith.constant 0 : index
      %19 = vector.load %arg5[%c0_18, %c0_19] : memref<128x32xf32, #tpu.memory_space<vmem>>, vector<128x32xf32>
      %cst_20 = arith.constant dense<0.000000e+00> : vector<16x32xf32>
      %20 = tpu.matmul %16, %19, %cst_20 {dimension_numbers = #tpu.dot_dimension_numbers<[1], [0], [0], [1], [0, 0, 1, 1], [], []>} : vector<16x128xf32>, vector<128x32xf32>, vector<16x32xf32> -> vector<16x32xf32>
      %c0_21 = arith.constant 0 : index
      %c0_22 = arith.constant 0 : index
      %21 = vector.load %arg8[%c0_21, %c0_22] : memref<32x64xf32, #tpu.memory_space<vmem>>, vector<32x64xf32>
      %cst_23 = arith.constant dense<0.000000e+00> : vector<16x64xf32>
      %22 = tpu.matmul %20, %21, %cst_23 {dimension_numbers = #tpu.dot_dimension_numbers<[1], [0], [0], [1], [0, 0, 1, 1], [], []>} : vector<16x32xf32>, vector<32x64xf32>, vector<16x64xf32> -> vector<16x64xf32>
      %c0_24 = arith.constant 0 : index
      %c0_25 = arith.constant 0 : index
      %23 = vector.load %arg7[%c0_24, %c0_25] : memref<1x64xf32, #tpu.memory_space<vmem>>, vector<1x64xf32>
      %24 = vector.broadcast %18 : vector<16x1xf32> to vector<16x64xf32>
      %25 = vector.broadcast %23 : vector<1x64xf32> to vector<16x64xf32>
      %26 = arith.mulf %24, %25 : vector<16x64xf32>
      %27 = arith.addf %22, %26 : vector<16x64xf32>
      %c0_26 = arith.constant 0 : index
      %c0_27 = arith.constant 0 : index
      %28 = vector.load %arg9[%c0_26, %c0_27] : memref<1x64xf32, #tpu.memory_space<vmem>>, vector<1x64xf32>
      %29 = vector.broadcast %28 : vector<1x64xf32> to vector<16x64xf32>
      %30 = arith.addf %27, %29 : vector<16x64xf32>
      %cst_28 = arith.constant 0.000000e+00 : f32
      %31 = vector.broadcast %cst_28 : f32 to vector<16x64xf32>
      %32 = arith.maximumf %30, %31 : vector<16x64xf32>
      %c0_29 = arith.constant 0 : index
      %c0_30 = arith.constant 0 : index
      %33 = vector.load %arg10[%c0_29, %c0_30] : memref<64x64xf32, #tpu.memory_space<vmem>>, vector<64x64xf32>
      %cst_31 = arith.constant dense<0.000000e+00> : vector<16x64xf32>
      %34 = tpu.matmul %32, %33, %cst_31 {dimension_numbers = #tpu.dot_dimension_numbers<[1], [0], [0], [1], [0, 0, 1, 1], [], []>} : vector<16x64xf32>, vector<64x64xf32>, vector<16x64xf32> -> vector<16x64xf32>
      %c0_32 = arith.constant 0 : index
      %c0_33 = arith.constant 0 : index
      %35 = vector.load %arg11[%c0_32, %c0_33] : memref<1x64xf32, #tpu.memory_space<vmem>>, vector<1x64xf32>
      %36 = vector.broadcast %35 : vector<1x64xf32> to vector<16x64xf32>
      %37 = arith.addf %34, %36 : vector<16x64xf32>
      %c0_34 = arith.constant 0 : index
      %c0_35 = arith.constant 0 : index
      %38 = vector.load %arg12[%c0_34, %c0_35] : memref<64x32xf32, #tpu.memory_space<vmem>>, vector<64x32xf32>
      %cst_36 = arith.constant dense<0.000000e+00> : vector<16x32xf32>
      %39 = tpu.matmul %37, %38, %cst_36 {dimension_numbers = #tpu.dot_dimension_numbers<[1], [0], [0], [1], [0, 0, 1, 1], [], []>} : vector<16x64xf32>, vector<64x32xf32>, vector<16x32xf32> -> vector<16x32xf32>
      %c0_37 = arith.constant 0 : index
      %c0_38 = arith.constant 0 : index
      %40 = vector.load %arg13[%c0_37, %c0_38] : memref<1x32xf32, #tpu.memory_space<vmem>>, vector<1x32xf32>
      %41 = vector.broadcast %40 : vector<1x32xf32> to vector<16x32xf32>
      %42 = arith.addf %39, %41 : vector<16x32xf32>
      %cst_39 = arith.constant 0.000000e+00 : f32
      %43 = vector.broadcast %cst_39 : f32 to vector<16x32xf32>
      %44 = arith.maximumf %42, %43 : vector<16x32xf32>
      %c0_40 = arith.constant 0 : index
      %c0_41 = arith.constant 0 : index
      %45 = vector.load %arg14[%c0_40, %c0_41] : memref<32x1xf32, #tpu.memory_space<vmem>>, vector<32x1xf32>
      %cst_42 = arith.constant dense<0.000000e+00> : vector<16x1xf32>
      %46 = tpu.matmul %44, %45, %cst_42 {dimension_numbers = #tpu.dot_dimension_numbers<[1], [0], [0], [1], [0, 0, 1, 1], [], []>} : vector<16x32xf32>, vector<32x1xf32>, vector<16x1xf32> -> vector<16x1xf32>
      %c0_43 = arith.constant 0 : index
      %c0_44 = arith.constant 0 : index
      %47 = vector.load %arg15[%c0_43, %c0_44] : memref<1x1xf32, #tpu.memory_space<vmem>>, vector<1x1xf32>
      %48 = vector.broadcast %47 : vector<1x1xf32> to vector<16x1xf32>
      %49 = arith.addf %46, %48 : vector<16x1xf32>
      %c0_45 = arith.constant 0 : index
      %c0_46 = arith.constant 0 : index
      %50 = vector.load %arg16[%c0_45, %c0_46] : memref<16x1xf32, #tpu.memory_space<vmem>>, vector<16x1xf32>
      tpu.vector_store %arg16[%c0_45, %c0_46], %49 {strides = array<i32>} : memref<16x1xf32, #tpu.memory_space<vmem>>, vector<16x1xf32>,
    } else {
    }
    return
  }
  func.func @transform_0(%arg0: i32, %arg1: i32) -> (i32, i32) {
    %c0_i32 = arith.constant 0 : i32
    return %arg0, %arg1 : i32, i32
  }
  func.func @transform_1(%arg0: i32, %arg1: i32) -> (i32, i32) {
    %c0_i32 = arith.constant 0 : i32
    %c0_i32_0 = arith.constant 0 : i32
    return %arg1, %c0_i32 : i32, i32
  }
  func.func @transform_2(%arg0: i32, %arg1: i32) -> (i32, i32) {
    %c0_i32 = arith.constant 0 : i32
    %c0_i32_0 = arith.constant 0 : i32
    return %arg0, %c0_i32 : i32, i32
  }
  func.func @transform_3(%arg0: i32, %arg1: i32) -> (i32, i32) {
    %c0_i32 = arith.constant 0 : i32
    %c0_i32_0 = arith.constant 0 : i32
    %c0_i32_1 = arith.constant 0 : i32
    return %c0_i32, %c0_i32_0 : i32, i32
  }
  func.func @transform_4(%arg0: i32, %arg1: i32) -> (i32, i32) {
    %c0_i32 = arith.constant 0 : i32
    %c0_i32_0 = arith.constant 0 : i32
    %c0_i32_1 = arith.constant 0 : i32
    return %c0_i32, %c0_i32_0 : i32, i32
  }
  func.func @transform_5(%arg0: i32, %arg1: i32) -> (i32, i32) {
    %c0_i32 = arith.constant 0 : i32
    %c0_i32_0 = arith.constant 0 : i32
    %c0_i32_1 = arith.constant 0 : i32
    return %c0_i32, %c0_i32_0 : i32, i32
  }
  func.func @transform_6(%arg0: i32, %arg1: i32) -> (i32, i32) {
    %c0_i32 = arith.constant 0 : i32
    %c0_i32_0 = arith.constant 0 : i32
    %c0_i32_1 = arith.constant 0 : i32
    return %c0_i32, %c0_i32_0 : i32, i32
  }
  func.func @transform_7(%arg0: i32, %arg1: i32) -> (i32, i32) {
    %c0_i32 = arith.constant 0 : i32
    %c0_i32_0 = arith.constant 0 : i32
    %c0_i32_1 = arith.constant 0 : i32
    return %c0_i32, %c0_i32_0 : i32, i32
  }
  func.func @transform_8(%arg0: i32, %arg1: i32) -> (i32, i32) {
    %c0_i32 = arith.constant 0 : i32
    %c0_i32_0 = arith.constant 0 : i32
    %c0_i32_1 = arith.constant 0 : i32
    return %c0_i32, %c0_i32_0 : i32, i32
  }
  func.func @transform_9(%arg0: i32, %arg1: i32) -> (i32, i32) {
    %c0_i32 = arith.constant 0 : i32
    %c0_i32_0 = arith.constant 0 : i32
    %c0_i32_1 = arith.constant 0 : i32
    return %c0_i32, %c0_i32_0 : i32, i32
  }
  func.func @transform_10(%arg0: i32, %arg1: i32) -> (i32, i32) {
    %c0_i32 = arith.constant 0 : i32
    %c0_i32_0 = arith.constant 0 : i32
    %c0_i32_1 = arith.constant 0 : i32
    return %c0_i32, %c0_i32_0 : i32, i32
  }
  func.func @transform_11(%arg0: i32, %arg1: i32) -> (i32, i32) {
    %c0_i32 = arith.constant 0 : i32
    %c0_i32_0 = arith.constant 0 : i32
    %c0_i32_1 = arith.constant 0 : i32
    return %c0_i32, %c0_i32_0 : i32, i32
  }
  func.func @transform_12(%arg0: i32, %arg1: i32) -> (i32, i32) {
    %c0_i32 = arith.constant 0 : i32
    %c0_i32_0 = arith.constant 0 : i32
    %c0_i32_1 = arith.constant 0 : i32
    return %c0_i32, %c0_i32_0 : i32, i32
  }
  func.func @transform_13(%arg0: i32, %arg1: i32) -> (i32, i32) {
    %c0_i32 = arith.constant 0 : i32
    %c0_i32_0 = arith.constant 0 : i32
    %c0_i32_1 = arith.constant 0 : i32
    return %c0_i32, %c0_i32_0 : i32, i32
  }
  func.func @transform_14(%arg0: i32, %arg1: i32) -> (i32, i32) {
    %c0_i32 = arith.constant 0 : i32
    %c0_i32_0 = arith.constant 0 : i32
    return %arg0, %c0_i32 : i32, i32
  }
}

</mosaic_0001>

<bundles_post_ra>
// kernel: critic_forward.1
= control target key start
LH: loop header
LB: loop body
LE: loop exit
PB: predicated region body
PF: predicated region fallthrough
CT: control target
= control target key end

     0   :  { %v1150_v0 = vmov 0.0   ;;  %vm1151_vm0 = vmmov 0   ;;  %vm389_vm1 = vcmask 261120   ;;  %vm497_vm2 = vcmask 523264   ;;  %s1458_s1 = inlined_call_operand.vmem [shape: bf16[128,128], index: 1, kind: input, shape index: {}]   ;;  %s1459_s4 = inlined_call_operand.vmem [shape: f32[128,1], index: 4, kind: input, shape index: {}]   ;;  %s1460_s0 = inlined_call_operand.vmem [shape: bf16[16,128], index: 0, kind: input, shape index: {}]   ;;  %s1461_s3 = inlined_call_operand.vmem [shape: f32[128,32], index: 3, kind: input, shape index: {}]   ;;  %s1462_s6 = inlined_call_operand.vmem [shape: f32[32,64], index: 6, kind: input, shape index: {}]   ;;  %s1463_s2 = inlined_call_operand.vmem [shape: f32[16,128], index: 2, kind: input, shape index: {}]   ;;  %s1464_s8 = inlined_call_operand.vmem [shape: f32[64,64], index: 8, kind: input, shape index: {}]   ;;  %s1465_s10 = inlined_call_operand.vmem [shape: f32[64,32], index: 10, kind: input, shape index: {}]   ;;  %s1466_s5 = inlined_call_operand.vmem [shape: f32[1,64], index: 5, kind: input, shape index: {}]   ;;  %s1467_s7 = inlined_call_operand.vmem [shape: f32[1,64], index: 7, kind: input, shape index: {}]   ;;  %s1468_s12 = inlined_call_operand.vmem [shape: f32[32,1], index: 12, kind: input, shape index: {}]   ;;  %s1469_s9 = inlined_call_operand.vmem [shape: f32[1,64], index: 9, kind: input, shape index: {}]   ;;  %s1470_s13 = inlined_call_operand.<no memory space> [shape: f32[1,1], index: 13, kind: input, shape index: {}]   ;;  %s1471_s11 = inlined_call_operand.vmem [shape: f32[1,32], index: 11, kind: input, shape index: {}]   ;;  %s1472_s14 = inlined_call_operand.vmem [shape: f32[16,1], index: 14, kind: output, shape index: {}]  }
   0x1   :  { %875 = vmatprep.subr.bf16.mxu0 %v1150_v0  ;;  %v1141_v1 = vld [vmem:[%s1458_s1] sm:$0xff]   ;;  %891 = vmatprep.mubr.msk.bf16.mxu0 %vm1151_vm0, %v1150_v0  ;;  %v1142_v2 = vld [vmem:[%s1458_s1 + $0x8] sm:$0xff]   ;;  %v1143_v3 = vld [vmem:[%s1458_s1 + $0x10] sm:$0xff]   ;;  %vm769_vm3 = vcmask 7168  }
   0x2   :  { %876 = vmatpush3.bf16.msra.mxu0 %v1141_v1  ;;  %v184_v4 = vld [vmem:[%s1459_s4] sm:$0xff]  ;;  %v185_v5 = vld [vmem:[%s1459_s4 + $0x8] sm:$0xff]  ;;  %v1144_v6 = vld [vmem:[%s1458_s1 + $0x18] sm:$0xff]  }
   0x3   :  { %877 = vmatprep.subr.bf16.mxu0 %v1150_v0  ;;  %v1025_v7 = vpack.c.bf16 %v185_v5, %v184_v4  ;;  %v186_v8 = vld [vmem:[%s1459_s4 + $0x10] sm:$0xff]  ;;  %v187_v9 = vld [vmem:[%s1459_s4 + $0x18] sm:$0xff]  ;;  %v188_v11 = vld [vmem:[%s1459_s4 + $0x20] sm:$0xff] }
   0x4   :  { %v1029_v10 = vpack.c.bf16 %v187_v9, %v186_v8  ;;  %v189_v12 = vld [vmem:[%s1459_s4 + $0x28] sm:$0xff]  ;;  %v1145_v13 = vld [vmem:[%s1458_s1 + $0x20] sm:$0xff]   ;;  %v190_v15 = vld [vmem:[%s1459_s4 + $0x30] sm:$0xff]  ;;  %v1152_v8 = vmov 0  }
   0x5   :  { %1026 = vmatprep.subr.bf16.mxu1 %v1025_v7  ;;  %v1033_v14 = vpack.c.bf16 %v189_v12, %v188_v11  ;;  %v191_v16 = vld [vmem:[%s1459_s4 + $0x38] sm:$0xff]  ;;  %v1146_v17 = vld [vmem:[%s1458_s1 + $0x28] sm:$0xff]   ;;  %v192_v19 = vld [vmem:[%s1459_s4 + $0x40] sm:$0xff]  ;;  %1140 = vset.pattern.permute.xlu0 %v1152_v8 }
   0x6   :  { %878 = vmatpush3.bf16.msra.mxu0 %v1142_v2  ;;  %1028 = vmatpush3.bf16.msra.mxu1 %v1025_v7  ;;  %v1037_v18 = vpack.c.bf16 %v191_v16, %v190_v15  ;;  %v193_v20 = vld [vmem:[%s1459_s4 + $0x48] sm:$0xff]  ;;  %v1147_v21 = vld [vmem:[%s1458_s1 + $0x30] sm:$0xff]   ;;  %v195_v24 = vld [vmem:[%s1459_s4 + $0x58] sm:$0xff] }
   0x7   :  { %879 = vmatprep.subr.bf16.mxu0 %v1150_v0  ;;  %1030 = vmatprep.subr.bf16.mxu1 %v1029_v10  ;;  %v1041_v22 = vpack.c.bf16 %v193_v20, %v192_v19  ;;  %v194_v23 = vld [vmem:[%s1459_s4 + $0x50] sm:$0xff]  ;;  %v275_v25 = vld [vmem:[%s1461_s3] sm:$0xff]  ;;  %v276_v26 = vld [vmem:[%s1461_s3 + $0x8] sm:$0xff] }
   0x8   :  { %v1148_v27 = vld [vmem:[%s1458_s1 + $0x38] sm:$0xff]   ;;  %v1045_v28 = vpack.c.bf16 %v195_v24, %v194_v23  ;;  %v1057_v29 = vpack.c.bf16 %v276_v26, %v275_v25  ;;  %v196_v30 = vld [vmem:[%s1459_s4 + $0x60] sm:$0xff]  ;;  %v197_v31 = vld [vmem:[%s1459_s4 + $0x68] sm:$0xff] }
   0x9   :  { %v277_v32 = vld [vmem:[%s1461_s3 + $0x10] sm:$0xff]  ;;  %v278_v33 = vld [vmem:[%s1461_s3 + $0x18] sm:$0xff]  ;;  %v1149_v34 = vld [vmem:[%s1460_s0] sm:$0xff]   ;;  %v1049_v35 = vpack.c.bf16 %v197_v31, %v196_v30 }
   0xa   :  { %880 = vmatpush3.bf16.msra.mxu0 %v1143_v3  ;;  %1032 = vmatpush3.bf16.msra.mxu1 %v1029_v10  ;;  %v1061_v36 = vpack.c.bf16 %v278_v33, %v277_v32  ;;  %v279_v37 = vld [vmem:[%s1461_s3 + $0x20] sm:$0xff]  ;;  %v280_v38 = vld [vmem:[%s1461_s3 + $0x28] sm:$0xff]  ;;  %v281_v40 = vld [vmem:[%s1461_s3 + $0x30] sm:$0xff] }
   0xb   :  { %881 = vmatprep.subr.bf16.mxu0 %v1150_v0  ;;  %1034 = vmatprep.subr.bf16.mxu1 %v1033_v14  ;;  %v1065_v39 = vpack.c.bf16 %v280_v38, %v279_v37  ;;  %v282_v41 = vld [vmem:[%s1461_s3 + $0x38] sm:$0xff]  ;;  %v283_v43 = vld [vmem:[%s1461_s3 + $0x40] sm:$0xff]  ;;  %v284_v44 = vld [vmem:[%s1461_s3 + $0x48] sm:$0xff] }
   0xc   :  { %v1069_v42 = vpack.c.bf16 %v282_v41, %v281_v40  ;;  %v1073_v45 = vpack.c.bf16 %v284_v44, %v283_v43  ;;  %v285_v46 = vld [vmem:[%s1461_s3 + $0x50] sm:$0xff]  ;;  %v286_v47 = vld [vmem:[%s1461_s3 + $0x58] sm:$0xff]  ;;  %v287_v49 = vld [vmem:[%s1461_s3 + $0x60] sm:$0xff] }
   0xd   :  { %v1077_v48 = vpack.c.bf16 %v286_v47, %v285_v46  ;;  %v288_v50 = vld [vmem:[%s1461_s3 + $0x68] sm:$0xff]  ;;  %v198_v52 = vld [vmem:[%s1459_s4 + $0x70] sm:$0xff]  ;;  %v199_v53 = vld [vmem:[%s1459_s4 + $0x78] sm:$0xff] }
   0xe   :  { %882 = vmatpush3.bf16.msra.mxu0 %v1144_v6  ;;  %1036 = vmatpush3.bf16.msra.mxu1 %v1033_v14  ;;  %v1081_v51 = vpack.c.bf16 %v288_v50, %v287_v49  ;;  %v289_v54 = vld [vmem:[%s1461_s3 + $0x70] sm:$0xff]  ;;  %v1053_v55 = vpack.c.bf16 %v199_v53, %v198_v52  ;;  %v290_v56 = vld [vmem:[%s1461_s3 + $0x78] sm:$0xff]  ;;  %v366_v58 = vld [vmem:[%s1462_s6] sm:$0xff] }
   0xf   :  { %883 = vmatprep.subr.bf16.mxu0 %v1150_v0  ;;  %1038 = vmatprep.subr.bf16.mxu1 %v1037_v18  ;;  %v1085_v57 = vpack.c.bf16 %v290_v56, %v289_v54  ;;  %v367_v59 = vld [vmem:[%s1462_s6 + $0x8] sm:$0xff]  ;;  %v180_v61 = vld [vmem:[%s1463_s2] sm:$0xff]  ;;  %v369_v1 = vld [vmem:[%s1462_s6 + $0x18] sm:$0xff] }
  0x10   :  { %v1089_v60 = vpack.c.bf16 %v367_v59, %v366_v58  ;;  %v181_v63 = vld [vmem:[%s1463_s2 + $0x8] sm:$0xff]  ;;  %v484_v15 = vld [vmem:[%s1464_s8 + $0x10] sm:$0xff]  ;;  %v486_v19 = vld [vmem:[%s1464_s8 + $0x20] sm:$0xff] }
  0x11   :  { %v483_v14 = vld [vmem:[%s1464_s8 + $0x8] sm:$0xff]  ;;  %v489_v23 = vld [vmem:[%s1464_s8 + $0x38] sm:$0xff]  ;;  %v579_v25 = vld [vmem:[%s1465_s10] sm:$0xff] }
  0x12   :  { %884 = vmatpush3.bf16.msra.mxu0 %v1145_v13  ;;  %1040 = vmatpush3.bf16.msra.mxu1 %v1037_v18  ;;  %v482_v13 = vld [vmem:[%s1464_s8] sm:$0xff]  ;;  %v487_v20 = vld [vmem:[%s1464_s8 + $0x28] sm:$0xff]  ;;  %v581_v40 = vld [vmem:[%s1465_s10 + $0x10] sm:$0xff] }
  0x13   :  { %885 = vmatprep.subr.bf16.mxu0 %v1150_v0  ;;  %1042 = vmatprep.subr.bf16.mxu1 %v1041_v22  ;;  %v1097_v16 = vpack.c.bf16 %v483_v14, %v482_v13  ;;  %v580_v26 = vld [vmem:[%s1465_s10 + $0x8] sm:$0xff]  ;;  %v785_v30 = vld [vmem:[%s1466_s5] ss:$0 sm:$0xff]  ;;  %v582_v41 = vld [vmem:[%s1465_s10 + $0x18] sm:$0xff] }
  0x14   :  { %v1117_v44 = vpack.c.bf16 %v582_v41, %v581_v40  ;;  %v584_v46 = vld [vmem:[%s1465_s10 + $0x28] sm:$0xff]  ;;  %v586_v49 = vld [vmem:[%s1465_s10 + $0x38] sm:$0xff]  ;;  %v789_v54 = vld [vmem:[%s1469_s9] ss:$0 sm:$0xff] }
  0x15   :  { %v678_v52 = vld [vmem:[%s1468_s12 + $0x8] sm:$0xff]  ;;  %v679_v59 = vld [vmem:[%s1468_s12 + $0x10] sm:$0xff] }
  0x16   :  { %886 = vmatpush3.bf16.msra.mxu0 %v1146_v17  ;;  %1044 = vmatpush3.bf16.msra.mxu1 %v1041_v22  ;;  %v485_v17 = vld [vmem:[%s1464_s8 + $0x18] sm:$0xff]  ;;  %v488_v22 = vld [vmem:[%s1464_s8 + $0x30] sm:$0xff] }
  0x17   :  { %887 = vmatprep.subr.bf16.mxu0 %v1150_v0  ;;  %1046 = vmatprep.subr.bf16.mxu1 %v1045_v28  ;;  %v1101_v18 = vpack.c.bf16 %v485_v17, %v484_v15  ;;  %v1109_v24 = vpack.c.bf16 %v489_v23, %v488_v22 }
  0x1a   :  { %888 = vmatpush3.bf16.msra.mxu0 %v1147_v21  ;;  %1048 = vmatpush3.bf16.msra.mxu1 %v1045_v28  ;;  %v1105_v21 = vpack.c.bf16 %v487_v20, %v486_v19 }
  0x1b   :  { %889 = vmatprep.subr.bf16.mxu0 %v1150_v0  ;;  %1050 = vmatprep.subr.bf16.mxu1 %v1049_v35  ;;  %v368_v0 = vld [vmem:[%s1462_s6 + $0x10] sm:$0xff] }
  0x1c   :  { %v1093_v7 = vpack.c.bf16 %v369_v1, %v368_v0 }
  0x1e   :  { %890 = vmatpush3.bf16.msra.mxu0 %v1148_v27  ;;  %1052 = vmatpush3.bf16.msra.mxu1 %v1049_v35  ;;  %v1113_v27 = vpack.c.bf16 %v580_v26, %v579_v25 }
  0x1f   :  { %1058 = vmatprep.subr.bf16.mxu0 %v1057_v29  ;;  %1054 = vmatprep.subr.bf16.mxu1 %v1053_v55 }
  0x21   :  { %892 = vmatmul.mubr.bf16.vlgmr.msra.gmra.mrb[0].mxu0 %v1149_v34  ;;  %v788_v34 = vld [vmem:[%s1467_s7] ss:$0 sm:$0xff] }
  0x22   :  { %1060 = vmatpush3.bf16.msra.mxu0 %v1057_v29  ;;  %1056 = vmatpush3.bf16.msra.mxu1 %v1053_v55 }
  0x23   :  { %1062 = vmatprep.subr.bf16.mxu0 %v1061_v36  ;;  %1090 = vmatprep.subr.bf16.mxu1 %v1089_v60 }
  0x26   :  { %1064 = vmatpush3.bf16.msra.mxu0 %v1061_v36 }
  0x27   :  { %1066 = vmatprep.subr.bf16.mxu0 %v1065_v39 }
  0x2a   :  { %1068 = vmatpush3.bf16.msra.mxu0 %v1065_v39 }
  0x2b   :  { %1070 = vmatprep.subr.bf16.mxu0 %v1069_v42 }
  0x2e   :  { %1072 = vmatpush3.bf16.msra.mxu0 %v1069_v42 }
  0x2f   :  { %1074 = vmatprep.subr.bf16.mxu0 %v1073_v45 }
  0x32   :  { %1076 = vmatpush3.bf16.msra.mxu0 %v1073_v45  ;;  %v583_v45 = vld [vmem:[%s1465_s10 + $0x20] sm:$0xff] }
  0x33   :  { %1078 = vmatprep.subr.bf16.mxu0 %v1077_v48  ;;  %v1121_v47 = vpack.c.bf16 %v584_v46, %v583_v45 }
  0x36   :  { %1080 = vmatpush3.bf16.msra.mxu0 %v1077_v48  ;;  %v585_v48 = vld [vmem:[%s1465_s10 + $0x30] sm:$0xff] }
  0x37   :  { %1082 = vmatprep.subr.bf16.mxu0 %v1081_v51  ;;  %v1125_v50 = vpack.c.bf16 %v586_v49, %v585_v48 }
  0x3a   :  { %1084 = vmatpush3.bf16.msra.mxu0 %v1081_v51  ;;  %v677_v51 = vld [vmem:[%s1468_s12] sm:$0xff] }
  0x3b   :  { %1086 = vmatprep.subr.bf16.mxu0 %v1085_v57  ;;  %v1129_v53 = vpack.c.bf16 %v678_v52, %v677_v51 }
  0x3e   :  { %1088 = vmatpush3.bf16.msra.mxu0 %v1085_v57 }
  0x3f   :  { %1130 = vmatprep.subr.bf16.mxu0 %v1129_v53 }
  0xf4   :  { %v164_v62 = vpop.f32.mrb[0].mxu0 }
  0xf5   :  { %v182_v2 = vadd.f32 %v180_v61, %v164_v62  ;;  %v893_v3 = vpop.f32.mrb[1].mxu0  ;;  %v19_v62 = vstv %s1470_s13 }
  0xf6   :  { %v167_v4 = vpop.f32.mrb[2].mxu0  ;;  %20 = vst [vmem:[#allocation3] sm:$0x1] %v19_v62 }
  0xf7   :  { %v183_v5 = vadd.f32 %v181_v63, %v167_v4  ;;  %v894_v6 = vpop.f32.mrb[3].mxu0  ;;  %927 = vmatprep.mubr.f32.mxu1 %v182_v2  ;;  %962 = vmatprep.mubr.f32.mxu0 %v182_v2  ;;  %v792_v63 = vld [vmem:[%s1471_s11] ss:$0 sm:$0xff] }
  0xf9   :  { %928 = vmatmul.mubr.f32.vlgmr.msra.gmra.mrb[0].mxu1 %v183_v5  ;;  %963 = vmatmul.mubr.f32.vlgmr.msra.gmra.mrb[4].mxu0 %v183_v5 }
  0xfa   :  { %1092 = vmatpush3.bf16.msra.mxu1 %v1089_v60  ;;  %1132 = vmatpush3.bf16.msra.mxu0 %v1129_v53  ;;  %v680_v60 = vld [vmem:[%s1468_s12 + $0x18] sm:$0xff] }
  0xfb   :  { %1094 = vmatprep.subr.bf16.mxu1 %v1093_v7  ;;  %v1133_v61 = vpack.c.bf16 %v680_v60, %v679_v59 }
  0xfd   :  { %1134 = vmatprep.subr.bf16.mxu0 %v1133_v61  ;;  %v795_v6 = vld [vmem:[#allocation3] ss:$0 sm:$0xff] }
  0xfe   :  { %1096 = vmatpush3.bf16.msra.mxu1 %v1093_v7  ;;  %1136 = vmatpush3.bf16.msra.mxu0 %v1133_v61 }
  0xff   :  { %1098 = vmatprep.subr.bf16.mxu1 %v1097_v16 }
 0x1cc   :  { %v929_v9 = vpop.f32.mrb[0].mxu1  ;;  %v964_v10 = vpop.f32.mrb[4].mxu0 }
 0x1cd   :  { %v266_v11 = vpop.f32.mrb[1].mxu1  ;;  %v357_v12 = vpop.f32.mrb[5].mxu0 }
 0x1ce   :  { %373 = vperm.xlu0 %1140, %v266_v11   ;;  %973 = vmatprep.mubr.msk.f32.mxu1 %vm389_vm1, %v357_v12 }
 0x1cf   :  { %974 = vmatmul.mubr.msk.f32.vlgmr.msra.gmra.mrb[2].mxu1 %vm389_vm1, %v964_v10 }
 0x1d0   :  { %1100 = vmatpush3.bf16.msra.mxu1 %v1097_v16 }
 0x1d1   :  { %1102 = vmatprep.subr.bf16.mxu1 %v1101_v18 }
 0x1d2   :  { %378 = vperm.xlu0 %1140, %v929_v9  }
 0x1d4   :  { %1104 = vmatpush3.bf16.msra.mxu1 %v1101_v18 }
 0x1d5   :  { %1106 = vmatprep.subr.bf16.mxu1 %v1105_v21 }
 0x1d8   :  { %1108 = vmatpush3.bf16.msra.mxu1 %v1105_v21 }
 0x1d9   :  { %1110 = vmatprep.subr.bf16.mxu1 %v1109_v24 }
 0x1dc   :  { %1112 = vmatpush3.bf16.msra.mxu1 %v1109_v24 }
 0x1dd   :  { %1114 = vmatprep.subr.bf16.mxu1 %v1113_v27 }
 0x24d   :  { %v374_v28 = vpop.permute.xlu0 %373 }
 0x24e   :  { %v387_v32 = vmul.f32 %v785_v30, %v374_v28 }
 0x251   :  { %v379_v29 = vpop.permute.xlu0 %378 }
 0x252   :  { %v388_v31 = vmul.f32 %v785_v30, %v379_v29 }
 0x2a2   :  { %v975_v33 = vpop.f32.mrb[2].mxu1 }
 0x2a3   :  { %v468_v35 = vadd.f32 %v975_v33, %v388_v31  ;;  %v462_v36 = vpop.f32.mrb[3].mxu1 }
 0x2a4   :  { %v463_v37 = vadd.f32 %v462_v36, %v387_v32 }
 0x2a5   :  { %v479_v38 = vadd.f32 %v788_v34, %v468_v35 }
 0x2a6   :  { %v478_v39 = vadd.f32 %v788_v34, %v463_v37 }
 0x2a7   :  { %v481_v43 = vmax.f32 %v479_v38, 0.0 }
 0x2a8   :  { %v480_v42 = vmax.f32 %v478_v39, 0.0 }
 0x2aa   :  { %992 = vmatprep.mubr.msk.f32.mxu1 %vm497_vm2, %v480_v42 }
 0x2ab   :  { %993 = vmatmul.mubr.msk.f32.vlgmr.msra.gmra.mrb[4].mxu1 %vm497_vm2, %v481_v43 }
 0x2ac   :  { %1116 = vmatpush3.bf16.msra.mxu1 %v1113_v27 }
 0x2ad   :  { %1118 = vmatprep.subr.bf16.mxu1 %v1117_v44 }
 0x2b0   :  { %1120 = vmatpush3.bf16.msra.mxu1 %v1117_v44 }
 0x2b1   :  { %1122 = vmatprep.subr.bf16.mxu1 %v1121_v47 }
 0x2b4   :  { %1124 = vmatpush3.bf16.msra.mxu1 %v1121_v47 }
 0x2b5   :  { %1126 = vmatprep.subr.bf16.mxu1 %v1125_v50 }
 0x2b8   :  { %1128 = vmatpush3.bf16.msra.mxu1 %v1125_v50 }
 0x37e   :  { %v994_v55 = vpop.f32.mrb[4].mxu1 }
 0x37f   :  { %v570_v56 = vpop.f32.mrb[5].mxu1  ;;  %v576_v58 = vadd.f32 %v994_v55, %v789_v54 }
 0x380   :  { %v571_v57 = vadd.f32 %v789_v54, %v570_v56 }
 0x382   :  { %1011 = vmatprep.mubr.msk.f32.mxu1 %vm497_vm2, %v571_v57 }
 0x383   :  { %1012 = vmatmul.mubr.msk.f32.vlgmr.msra.gmra.mrb[6].mxu1 %vm497_vm2, %v576_v58 }
 0x456   :  { %v1013_v0 = vpop.f32.mrb[6].mxu1 }
 0x457   :  { %v672_v1 = vadd.f32 %v1013_v0, %v792_v63  ;;  %v666_v2 = vpop.f32.mrb[7].mxu1 }
 0x458   :  { %v667_v3 = vadd.f32 %v792_v63, %v666_v2 }
 0x459   :  { %v676_v5 = vmax.f32 %v672_v1, 0.0 }
 0x45a   :  { %v675_v4 = vmax.f32 %v667_v3, 0.0 }
 0x45c   :  { %1022 = vmatprep.mubr.msk.f32.mxu0 %vm389_vm1, %v675_v4 }
 0x45d   :  { %1023 = vmatmul.mubr.msk.f32.vlgmr.msra.gmra.mrb[6].mxu0 %vm389_vm1, %v676_v5 }
 0x530   :  { %v1024_v7 = vpop.f32.mrb[6].mxu0 }
 0x531   :  { %v766_v8 = vadd.f32 %v1024_v7, %v795_v6  ;;  %v760_v9 = vpop.f32.mrb[7].mxu0 }
 0x532   :  { %v761_v10 = vadd.f32 %v795_v6, %v760_v9 }
 0x533   :  { %771 = vst.msk [vmem:[%s1472_s14 + $0x8] sm:$0xff] %vm769_vm3, %v766_v8 }
 0x534   :  { %770 = vst.msk [vmem:[%s1472_s14] sm:$0xff] %vm769_vm3, %v761_v10 }

</bundles_post_ra>
